<compile_context>
chip_gen: v7x
topology: tpu7x:2x2x1
jax: 0.10.0
libtpu: 0.0.40
codegen_flags: <defaults>
</compile_context>

<pallas_src>
import functools

import jax
import jax.numpy as jnp
from jax.experimental import pallas as pl
from jax.experimental.pallas import tpu as pltpu

_LANE = 128


def _round_up(x: int, m: int) -> int:
    return ((x + m - 1) // m) * m


def _tpu_tuning():
    """Per-generation (per-input block target bytes, vmem_limit_bytes)."""
    try:
        kind = jax.devices()[0].device_kind.lower()
    except Exception:
        kind = ""
    if "v5 lite" in kind or "v5e" in kind or "v5lite" in kind:
        # v5e: ~0.8 TB/s HBM — 2 MiB/input/step already keeps the ~0.35 us
        # per-step pipeline overhead <8%; explicit vmem raise (default is 16 MiB).
        return 2 << 20, 32 << 20
    if "v6" in kind:
        # v6e: ~1.35 TB/s HBM, 128 MiB physical VMEM — 4 MiB/input/step.
        return 4 << 20, 64 << 20
    if "7" in kind:
        # v7x: ~3.2 TB/s per TC but only 64 MiB VMEM.  4 MiB/input/step keeps
        # (2 inputs x 2 pipeline buffers) + the f32 in-kernel intermediates
        # comfortably under a 48 MiB scoped limit (leave Mosaic headroom).
        return 4 << 20, 48 << 20
    # Unknown generation: conservative limit that is safe everywhere.
    return 4 << 20, 48 << 20


def _choose_row_tile(n: int, d: int, itemsize: int, target_block_bytes: int) -> int:
    """Row tile TN (multiple of 128).

    Big enough to amortize the ~0.35 us per-grid-step pipeline overhead against
    HBM time, small enough to fit VMEM (double-buffered inputs + f32
    intermediates), and capped at ~ceil(N/4) so the 'parallel' grid axis has
    >= 4 roughly balanced steps (v7x megacore load balance, no padded-only DMA).
    """
    cap = max(_LANE, (target_block_bytes // (d * itemsize)) // _LANE * _LANE)
    balanced = _round_up(pl.cdiv(n, 4), _LANE)
    return int(max(_LANE, min(cap, balanced)))


def _cone_args_kernel(anchor_ref, other_ref, out_ref, *, min_norm: float, eps: float):
    """(TN, D) input row tiles -> (2, TN) lane-dense trig arguments.

    out_ref row 0: argument of arcsin in half_cone_aperture(rep_other).
    out_ref row 1: argument of arccos in cone_angle_at_u(rep_other, rep_anchor).
    """
    u = anchor_ref[...].astype(jnp.float32)     # child    (rep_anchor), (TN, D)
    tip = other_ref[...].astype(jnp.float32)    # cone tip (rep_other),  (TN, D)
    d = tip.shape[-1]

    # Row-wise reductions over the embedding dim via a ones-vector MXU matmul
    # ('kd,nd->kn' == trans-B matmul, the q@k^T pattern).  Results land as
    # lane-dense (1, TN) rows, so all per-pair math below is lane-dense.
    # The 8-row ones lhs keeps the matmul shapes tile-native; row 0 is used.
    ones8 = jnp.ones((8, d), jnp.float32)

    def row_sum(p):  # (TN, D) -> (1, TN)
        return jnp.einsum("kd,nd->kn", ones8, p,
                          preferred_element_type=jnp.float32)[0:1, :]

    sq_norm_tip = row_sum(tip * tip)        # ||tip||^2   (1, TN)
    sq_norm_child = row_sum(u * u)          # ||u||^2     (1, TN)
    dot_prod = row_sum(tip * u)             # <tip, u>    (1, TN)
    # ||tip - u||^2 algebraically: saves a full-tile pass + reduction.
    sq_edist = jnp.maximum(sq_norm_tip + sq_norm_child - 2.0 * dot_prod, 0.0)

    # --- half_cone_aperture argument: min_norm * (1 - sq) / sqrt(sq) ---
    sq_tip_c = jnp.clip(sq_norm_tip, min_norm + eps, 1.0 - eps)
    out_ref[0:1, :] = min_norm * (1.0 - sq_tip_c) * jax.lax.rsqrt(sq_tip_c)

    # --- cone_angle_at_u argument ---
    # numerator   = <tip,u>(1 + ||tip||^2) - ||tip||^2 (1 + ||u||^2)
    # denominator = ||tip|| * ||tip-u|| * sqrt(1 + ||u||^2||tip||^2 - 2<tip,u>)
    #             = sqrt(||tip||^2 * ||tip-u||^2 * (1 + ...))   (one EUP rsqrt)
    numerator = dot_prod * (1.0 + sq_norm_tip) - sq_norm_tip * (1.0 + sq_norm_child)
    den_sq = sq_norm_tip * sq_edist * (1.0 + sq_norm_child * sq_norm_tip
                                       - 2.0 * dot_prod)
    # 1 / max(denominator, eps) without a divide: cap rsqrt at 1/eps.
    inv_den = jnp.minimum(jax.lax.rsqrt(jnp.maximum(den_sq, 0.0)), 1.0 / eps)
    out_ref[1:2, :] = jnp.clip(numerator * inv_den, -1.0 + eps, 1.0 - eps)


def hyperbolic_entailment_cone_loss(rep_anchor, rep_other, labels,
                                    min_euclidean_norm: float = 0.1,
                                    margin: float = 0.1,
                                    eps: float = 1e-5):
    """Forward pass of HyperbolicEntailmentConeLoss (PoincareBall, c=1.0)."""
    N, D = rep_anchor.shape
    assert rep_other.shape == (N, D)

    target_block_bytes, vmem_limit = _tpu_tuning()
    itemsize = jnp.dtype(rep_anchor.dtype).itemsize
    tn = _choose_row_tile(N, D, itemsize, target_block_bytes)
    grid = (pl.cdiv(N, tn),)   # ragged last block: no wrapper pad, no padded DMA

    kernel = functools.partial(_cone_args_kernel,
                               min_norm=float(min_euclidean_norm),
                               eps=float(eps))

    trig_args = pl.pallas_call(
        kernel,
        out_shape=jax.ShapeDtypeStruct((2, N), jnp.float32),
        grid=grid,
        in_specs=[pl.BlockSpec((tn, D), lambda i: (i, 0)),
                  pl.BlockSpec((tn, D), lambda i: (i, 0))],
        out_specs=pl.BlockSpec((2, tn), lambda i: (0, i)),
        compiler_params=pltpu.CompilerParams(
            dimension_semantics=("parallel",),
            vmem_limit_bytes=vmem_limit),
    )(rep_anchor, rep_other)

    sin_arg = trig_args[0]
    cos_arg = trig_args[1]

    # TODO(synk): arcsin/arccos have no guaranteed Mosaic TPU lowering; the
    # O(N) inverse trig + margin/label combine + mean stay in plain JAX.
    half_aperture = jnp.clip(jnp.arcsin(sin_arg), -1.0 + eps, 1.0 - eps)
    cone_angle = jnp.arccos(cos_arg)
    energies = jax.nn.relu(cone_angle - half_aperture)

    labels_f = labels.astype(jnp.float32)
    cone_loss = labels_f * energies + (1.0 - labels_f) * jax.nn.relu(margin - energies)
    return jnp.mean(cone_loss)


def _reference_loss(rep_anchor, rep_other, labels,
                    min_norm=0.1, margin=0.1, eps=1e-5):
    """Pure-JAX transcription of the PyTorch module (for correctness check)."""
    tip = rep_other.astype(jnp.float32)
    u = rep_anchor.astype(jnp.float32)
    sq_norm_tip = jnp.clip(jnp.sum(tip ** 2, -1), min_norm + eps, 1 - eps)
    aperture = jnp.clip(
        jnp.arcsin(min_norm * (1 - sq_norm_tip) / jnp.sqrt(sq_norm_tip)),
        -1 + eps, 1 - eps)
    norm_tip = jnp.linalg.norm(tip, axis=-1)
    norm_child = jnp.linalg.norm(u, axis=-1)
    dot = jnp.sum(tip * u, -1)
    edist = jnp.linalg.norm(tip - u, axis=-1)
    num = dot * (1 + norm_tip ** 2) - norm_tip ** 2 * (1 + norm_child ** 2)
    den = norm_tip * edist * jnp.sqrt(1 + norm_child ** 2 * norm_tip ** 2 - 2 * dot)
    angle = jnp.arccos(jnp.clip(num / jnp.maximum(den, eps), -1 + eps, 1 - eps))
    e = jax.nn.relu(angle - aperture)
    lf = labels.astype(jnp.float32)
    return jnp.mean(lf * e + (1 - lf) * jax.nn.relu(margin - e))


def _make_points(key, n, d, lo, hi):
    """Deterministic points inside the unit ball with norms in [lo, hi]."""
    k1, k2 = jax.random.split(key)
    x = jax.random.normal(k1, (n, d), dtype=jnp.float32)
    x = x / jnp.linalg.norm(x, axis=-1, keepdims=True)
    return x * jax.random.uniform(k2, (n, 1), minval=lo, maxval=hi)


if __name__ == "__main__":
    keys = jax.random.split(jax.random.PRNGKey(0), 6)

    # Case 1: toy shape (8 labelled pairs, 32-dim Poincare-ball embeddings).
    a = _make_points(keys[0], 8, 32, 0.25, 0.95)
    b = _make_points(keys[1], 8, 32, 0.35, 0.95)
    labels = jax.random.bernoulli(keys[2], 0.5, (8,)).astype(jnp.int32)
    loss = jax.block_until_ready(hyperbolic_entailment_cone_loss(a, b, labels))
    ref = _reference_loss(a, b, labels)
    assert jnp.allclose(loss, ref, atol=2e-4, rtol=2e-4), (loss, ref)

    # Case 2: non-multiple-of-128 row count exercises the ragged last block
    # and a 4-step "parallel" grid (no wrapper-side pad / transpose).
    a2 = _make_points(keys[3], 500, 64, 0.2, 0.95)
    b2 = _make_points(keys[4], 500, 64, 0.3, 0.95)
    labels2 = jax.random.bernoulli(keys[5], 0.5, (500,)).astype(jnp.int32)
    loss2 = jax.block_until_ready(hyperbolic_entailment_cone_loss(a2, b2, labels2))
    ref2 = _reference_loss(a2, b2, labels2)
    assert jnp.allclose(loss2, ref2, atol=2e-4, rtol=2e-4), (loss2, ref2)

    print("KERNEL_OK")
</pallas_src>

<mosaic_0001>
module attributes {stable_mosaic.version = 11 : i64} {
  func.func @_cone_args_kernel(%arg0: i32, %arg1: memref<128x32xf32, #tpu.memory_space<vmem>>, %arg2: memref<128x32xf32, #tpu.memory_space<vmem>>, %arg3: memref<2x128xf32, #tpu.memory_space<vmem>>) attributes {dimension_semantics = [#tpu.dimension_semantics<parallel>], iteration_bounds = array<i64: 1>, scalar_prefetch = 0 : i64, scratch_operands = 0 : i64, tpu.core_type = #tpu.core_type<tc>, window_params = [{transform_indices = @transform_0, window_bounds = array<i64: 128, 32>}, {transform_indices = @transform_1, window_bounds = array<i64: 128, 32>}, {transform_indices = @transform_2, window_bounds = array<i64: 2, 128>}]} {
    %c0 = arith.constant 0 : index
    %c0_0 = arith.constant 0 : index
    %0 = vector.load %arg1[%c0, %c0_0] : memref<128x32xf32, #tpu.memory_space<vmem>>, vector<128x32xf32>
    %c0_1 = arith.constant 0 : index
    %c0_2 = arith.constant 0 : index
    %1 = vector.load %arg2[%c0_1, %c0_2] : memref<128x32xf32, #tpu.memory_space<vmem>>, vector<128x32xf32>
    %cst = arith.constant 1.000000e+00 : f32
    %2 = vector.broadcast %cst : f32 to vector<8x32xf32>
    %3 = arith.mulf %1, %1 : vector<128x32xf32>
    "tpu.trace_start"() <{level = 10 : i32, message = "kd,nd->kn"}> : () -> ()
    %cst_3 = arith.constant dense<0.000000e+00> : vector<8x128xf32>
    %4 = tpu.matmul %2, %3, %cst_3 {dimension_numbers = #tpu.dot_dimension_numbers<[1], [1], [0], [0], [0, 0, 1, 0], [], []>} : vector<8x32xf32>, vector<128x32xf32>, vector<8x128xf32> -> vector<8x128xf32>
    "tpu.trace_stop"() : () -> ()
    %5 = vector.extract_strided_slice %4 {offsets = [0, 0], sizes = [1, 128], strides = [1, 1]} : vector<8x128xf32> to vector<1x128xf32>
    %6 = arith.mulf %0, %0 : vector<128x32xf32>
    "tpu.trace_start"() <{level = 10 : i32, message = "kd,nd->kn"}> : () -> ()
    %cst_4 = arith.constant dense<0.000000e+00> : vector<8x128xf32>
    %7 = tpu.matmul %2, %6, %cst_4 {dimension_numbers = #tpu.dot_dimension_numbers<[1], [1], [0], [0], [0, 0, 1, 0], [], []>} : vector<8x32xf32>, vector<128x32xf32>, vector<8x128xf32> -> vector<8x128xf32>
    "tpu.trace_stop"() : () -> ()
    %8 = vector.extract_strided_slice %7 {offsets = [0, 0], sizes = [1, 128], strides = [1, 1]} : vector<8x128xf32> to vector<1x128xf32>
    %9 = arith.mulf %1, %0 : vector<128x32xf32>
    "tpu.trace_start"() <{level = 10 : i32, message = "kd,nd->kn"}> : () -> ()
    %cst_5 = arith.constant dense<0.000000e+00> : vector<8x128xf32>
    %10 = tpu.matmul %2, %9, %cst_5 {dimension_numbers = #tpu.dot_dimension_numbers<[1], [1], [0], [0], [0, 0, 1, 0], [], []>} : vector<8x32xf32>, vector<128x32xf32>, vector<8x128xf32> -> vector<8x128xf32>
    "tpu.trace_stop"() : () -> ()
    %11 = vector.extract_strided_slice %10 {offsets = [0, 0], sizes = [1, 128], strides = [1, 1]} : vector<8x128xf32> to vector<1x128xf32>
    %12 = arith.addf %5, %8 : vector<1x128xf32>
    %cst_6 = arith.constant 2.000000e+00 : f32
    %13 = vector.broadcast %cst_6 : f32 to vector<1x128xf32>
    %14 = arith.mulf %13, %11 : vector<1x128xf32>
    %15 = arith.subf %12, %14 : vector<1x128xf32>
    %cst_7 = arith.constant 0.000000e+00 : f32
    %16 = vector.broadcast %cst_7 : f32 to vector<1x128xf32>
    %17 = arith.maximumf %15, %16 : vector<1x128xf32>
    %cst_8 = arith.constant 1.000100e-01 : f32
    %cst_9 = arith.constant 0.999989986 : f32
    %18 = vector.broadcast %cst_8 : f32 to vector<1x128xf32>
    %19 = arith.maximumf %18, %5 : vector<1x128xf32>
    %20 = vector.broadcast %cst_9 : f32 to vector<1x128xf32>
    %21 = arith.minimumf %20, %19 : vector<1x128xf32>
    %cst_10 = arith.constant 1.000000e+00 : f32
    %22 = vector.broadcast %cst_10 : f32 to vector<1x128xf32>
    %23 = arith.subf %22, %21 : vector<1x128xf32>
    %cst_11 = arith.constant 1.000000e-01 : f32
    %24 = vector.broadcast %cst_11 : f32 to vector<1x128xf32>
    %25 = arith.mulf %24, %23 : vector<1x128xf32>
    %26 = math.rsqrt %21 : vector<1x128xf32>
    %27 = arith.mulf %25, %26 : vector<1x128xf32>
    %c0_12 = arith.constant 0 : index
    %c0_13 = arith.constant 0 : index
    %28 = vector.load %arg3[%c0_12, %c0_13] : memref<2x128xf32, #tpu.memory_space<vmem>>, vector<1x128xf32>
    tpu.vector_store %arg3[%c0_12, %c0_13], %27 {strides = array<i32>} : memref<2x128xf32, #tpu.memory_space<vmem>>, vector<1x128xf32>,
    %cst_14 = arith.constant 1.000000e+00 : f32
    %29 = vector.broadcast %cst_14 : f32 to vector<1x128xf32>
    %30 = arith.addf %29, %5 : vector<1x128xf32>
    %31 = arith.mulf %11, %30 : vector<1x128xf32>
    %cst_15 = arith.constant 1.000000e+00 : f32
    %32 = vector.broadcast %cst_15 : f32 to vector<1x128xf32>
    %33 = arith.addf %32, %8 : vector<1x128xf32>
    %34 = arith.mulf %5, %33 : vector<1x128xf32>
    %35 = arith.subf %31, %34 : vector<1x128xf32>
    %36 = arith.mulf %5, %17 : vector<1x128xf32>
    %37 = arith.mulf %8, %5 : vector<1x128xf32>
    %cst_16 = arith.constant 1.000000e+00 : f32
    %38 = vector.broadcast %cst_16 : f32 to vector<1x128xf32>
    %39 = arith.addf %38, %37 : vector<1x128xf32>
    %cst_17 = arith.constant 2.000000e+00 : f32
    %40 = vector.broadcast %cst_17 : f32 to vector<1x128xf32>
    %41 = arith.mulf %40, %11 : vector<1x128xf32>
    %42 = arith.subf %39, %41 : vector<1x128xf32>
    %43 = arith.mulf %36, %42 : vector<1x128xf32>
    %cst_18 = arith.constant 0.000000e+00 : f32
    %44 = vector.broadcast %cst_18 : f32 to vector<1x128xf32>
    %45 = arith.maximumf %43, %44 : vector<1x128xf32>
    %46 = math.rsqrt %45 : vector<1x128xf32>
    %cst_19 = arith.constant 1.000000e+05 : f32
    %47 = vector.broadcast %cst_19 : f32 to vector<1x128xf32>
    %48 = arith.minimumf %46, %47 : vector<1x128xf32>
    %49 = arith.mulf %35, %48 : vector<1x128xf32>
    %cst_20 = arith.constant -0.999989986 : f32
    %cst_21 = arith.constant 0.999989986 : f32
    %50 = vector.broadcast %cst_20 : f32 to vector<1x128xf32>
    %51 = arith.maximumf %50, %49 : vector<1x128xf32>
    %52 = vector.broadcast %cst_21 : f32 to vector<1x128xf32>
    %53 = arith.minimumf %52, %51 : vector<1x128xf32>
    %c1 = arith.constant 1 : index
    %c0_22 = arith.constant 0 : index
    %54 = vector.load %arg3[%c1, %c0_22] : memref<2x128xf32, #tpu.memory_space<vmem>>, vector<1x128xf32>
    tpu.vector_store %arg3[%c1, %c0_22], %53 {strides = array<i32>} : memref<2x128xf32, #tpu.memory_space<vmem>>, vector<1x128xf32>,
    return
  }
  func.func @transform_0(%arg0: i32) -> (i32, i32) {
    %c0_i32 = arith.constant 0 : i32
    %c0_i32_0 = arith.constant 0 : i32
    return %arg0, %c0_i32 : i32, i32
  }
  func.func @transform_1(%arg0: i32) -> (i32, i32) {
    %c0_i32 = arith.constant 0 : i32
    %c0_i32_0 = arith.constant 0 : i32
    return %arg0, %c0_i32 : i32, i32
  }
  func.func @transform_2(%arg0: i32) -> (i32, i32) {
    %c0_i32 = arith.constant 0 : i32
    %c0_i32_0 = arith.constant 0 : i32
    return %c0_i32, %arg0 : i32, i32
  }
}

</mosaic_0001>

<bundles_post_ra>
// kernel: tpu_custom_call.1
= control target key start
LH: loop header
LB: loop body
LE: loop exit
PB: predicated region body
PF: predicated region fallthrough
CT: control target
= control target key end

     0   :  { %7 = vsyncpa [#allocation3], 0  ;;  %s1130_s0 = inlined_call_operand.hbm [shape: f32[8,32], index: 0, kind: input, shape index: {}]   ;;  %s1131_s1 = inlined_call_operand.hbm [shape: f32[8,32], index: 1, kind: input, shape index: {}]   ;;  %s1132_s2 = inlined_call_operand.hbm [shape: f32[2,8], index: 2, kind: output, shape index: {}]  }
   0x1   :  { %8 = vsyncpa [#allocation6], 0 }
   0x2   :  { %9 = vsyncpa [#allocation4], 0 }
   0x3   :  { %14 = vsyncadd [#allocation3], 1920  ;;  %s911_s9 = smov [#allocation2]   ;;  %s839_s13 = scalar_lea.hbm %s1130_s0, 128 }
   0x4   :  { %s15_s10 = sshll.u32 %s911_s9, 4  ;;  %p840_p0 = scmp.ne.s32.totalorder %s1130_s0, %s839_s13  ;;  %s16_s10 = int_to_ptr.vmem [resolvable:$true] %s15_s10 }
   0x5   :  { %p843_p1 = scmp.lt.u32.totalorder %s839_s13, %s1130_s0 }
   0x7   :  { %p845_p2 = pnand %p843_p1, %p840_p0 }
   0x9   :  { %848 = shalt.err (!%p845_p2)
}
   0xa   :  { %s849_s18 = scalar_lea.vmem %s16_s10, 128  ;;  %s853_s19 = scalar_lea.vmem %s16_s10, 2048 }
   0xb   :  { %p850_p3 = scmp.ne.s32.totalorder %s16_s10, %s849_s18  ;;  %p854_p4 = scmp.lt.s32.totalorder %s16_s10, %s16_s10 }
   0xc   :  { %p855_p5 = scmp.lt.s32.totalorder %s853_s19, %s849_s18 }
   0xe   :  { %p856_p6 = por %p855_p5, %p854_p4 }
  0x10   :  { %p857_p7 = pnand %p856_p6, %p850_p3 }
  0x12   :  { %860 = shalt.err (!%p857_p7)
}
  0x13   :  { %s912_s20 = smov 128   ;;  %s913_s21 = smov 8  }
  0x14   :  { %21 = dma.hbm_to_vmem [thread:$0]  %s1130_s0, 128, %s16_s10, [#allocation3], %s912_s20, %s912_s20, %s913_s21  }
  0x15   :  { %26 = vsyncadd [#allocation6], 1920  ;;  %s914_s24 = smov [#allocation5]   ;;  %s861_s28 = scalar_lea.hbm %s1131_s1, 128 }
  0x16   :  { %s27_s25 = sshll.u32 %s914_s24, 4  ;;  %p862_p8 = scmp.ne.s32.totalorder %s1131_s1, %s861_s28  ;;  %s28_s25 = int_to_ptr.vmem [resolvable:$true] %s27_s25 }
  0x17   :  { %p865_p9 = scmp.lt.u32.totalorder %s861_s28, %s1131_s1 }
  0x19   :  { %p867_p10 = pnand %p865_p9, %p862_p8 }
  0x1b   :  { %870 = shalt.err (!%p867_p10)
}
  0x1c   :  { %s871_s5 = scalar_lea.vmem %s28_s25, 128  ;;  %s875_s0 = scalar_lea.vmem %s28_s25, 2048 }
  0x1d   :  { %p872_p11 = scmp.ne.s32.totalorder %s28_s25, %s871_s5  ;;  %p876_p12 = scmp.lt.s32.totalorder %s28_s25, %s28_s25 }
  0x1e   :  { %p877_p13 = scmp.lt.s32.totalorder %s875_s0, %s871_s5 }
  0x20   :  { %p878_p0 = por %p877_p13, %p876_p12 }
  0x22   :  { %p879_p1 = pnand %p878_p0, %p872_p11 }
  0x24   :  { %882 = shalt.err (!%p879_p1)
}
  0x25   :  { %33 = dma.hbm_to_vmem [thread:$0]  %s1131_s1, 128, %s28_s25, [#allocation6], %s912_s20, %s912_s20, %s913_s21  }
  0x26   :  { %905 = dma.done.wait [#allocation3], 2048  }
  0x27   :  { %906 = vsyncadd [#allocation3], 4294965248 }
  0x28   :  { %907 = dma.done.wait [#allocation6], 2048  }
  0x29   :  { %908 = vsyncadd [#allocation6], 4294965248  ;;  %v915_v0 = vmov 0.0|0.0   ;;  %vm916_vm0 = vmmov 0   ;;  %v917_v1 = vmov 0.0   ;;  %vm88_vm1 = vcmask 261120  }
  0x2a   :  { %730 = vmatprep.subr.bf16.mxu0 %v915_v0  ;;  %762 = vmatprep.subr.bf16.mxu1 %v915_v0  ;;  %v56_v2 = vld [vmem:[#allocation5] sm:$0xff]  ;;  %v57_v3 = vld [vmem:[#allocation5 + $0x8] sm:$0xff]  ;;  %vm969_vm2 = vmpackc.low %vm88_vm1, %vm88_vm1  ;;  %s919_s1 = smov [#allocation7]  }
  0x2b   :  { %657 = vmatprep.mubr.msk.f32.mxu0 %vm916_vm0, %v917_v1  ;;  %692 = vmatprep.mubr.msk.f32.mxu1 %vm916_vm0, %v917_v1  ;;  %v40_v4 = vld [vmem:[#allocation2] sm:$0xff]  ;;  %v72_v5 = vmul.f32 %v56_v2, %v56_v2  ;;  %v73_v6 = vmul.f32 %v57_v3, %v57_v3  ;;  %v41_v7 = vld [vmem:[#allocation2 + $0x8] sm:$0xff]  ;;  %v58_v13 = vld [vmem:[#allocation5 + $0x10] sm:$0xff]  ;;  %s512_s8 = sshll.u32 %s919_s1, 4  ;;  %s513_s8 = int_to_ptr.vmem [resolvable:$true] %s512_s8 }
  0x2c   :  { %v210_v8 = vmul.f32 %v40_v4, %v40_v4  ;;  %v965_v9 = vmul.f32 %v56_v2, %v40_v4  ;;  %v211_v11 = vmul.f32 %v41_v7, %v41_v7  ;;  %v973_v12 = vmul.f32 %v57_v3, %v41_v7  ;;  %v59_v14 = vld [vmem:[#allocation5 + $0x18] sm:$0xff]  ;;  %v42_v16 = vld [vmem:[#allocation2 + $0x10] sm:$0xff]  ;;  %v60_v24 = vld [vmem:[#allocation5 + $0x20] sm:$0xff]  ;;  %s883_s9 = scalar_lea.vmem %s513_s8, 32  ;;  %p888_p3 = scmp.lt.s32.totalorder %s513_s8, %s513_s8 }
  0x2d   :  { %v731_v15 = vpack.c.bf16 %v73_v6, %v72_v5  ;;  %v43_v17 = vld [vmem:[#allocation2 + $0x18] sm:$0xff]  ;;  %v74_v20 = vmul.f32 %v58_v13, %v58_v13  ;;  %v75_v21 = vmul.f32 %v59_v14, %v59_v14  ;;  %v212_v22 = vmul.f32 %v42_v16, %v42_v16  ;;  %v61_v26 = vld [vmem:[#allocation5 + $0x28] sm:$0xff]  ;;  %v44_v27 = vld [vmem:[#allocation2 + $0x20] sm:$0xff]  ;;  %p884_p2 = scmp.ne.s32.totalorder %s513_s8, %s883_s9  ;;  %p889_p4 = scmp.lt.s32.totalorder %s883_s9, %s883_s9 }
  0x2e   :  { %v763_v18 = vpack.c.bf16 %v211_v11, %v210_v8  ;;  %v795_v19 = vpack.c.bf16 %v973_v12, %v965_v9  ;;  %v213_v23 = vmul.f32 %v43_v17, %v43_v17  ;;  %v45_v28 = vld [vmem:[#allocation2 + $0x28] sm:$0xff]  ;;  %v62_v30 = vld [vmem:[#allocation5 + $0x30] sm:$0xff]  ;;  %v63_v31 = vld [vmem:[#allocation5 + $0x38] sm:$0xff]  ;;  %v983_v34 = vmul.f32 %v58_v13, %v42_v16 }
  0x2f   :  { %733 = vmatpush3.bf16.xpose.msk.msra.mxu0 %vm969_vm2, %v731_v15  ;;  %v735_v25 = vpack.c.bf16 %v75_v21, %v74_v20  ;;  %v46_v32 = vld [vmem:[#allocation2 + $0x30] sm:$0xff]  ;;  %v47_v33 = vld [vmem:[#allocation2 + $0x38] sm:$0xff]  ;;  %v985_v35 = vmul.f32 %v59_v14, %v43_v17  ;;  %v76_v36 = vmul.f32 %v60_v24, %v60_v24  ;;  %v64_v37 = vld [vmem:[#allocation5 + $0x40] sm:$0xff]  ;;  %v77_v40 = vmul.f32 %v61_v26, %v61_v26  ;;  %p890_p5 = por %p889_p4, %p888_p3 }
  0x30   :  { %765 = vmatpush3.bf16.xpose.msk.msra.mxu1 %vm969_vm2, %v763_v18  ;;  %734 = vmatprep.subr.bf16.mxu0 %v915_v0  ;;  %v767_v29 = vpack.c.bf16 %v213_v23, %v212_v22  ;;  %v65_v38 = vld [vmem:[#allocation5 + $0x48] sm:$0xff]  ;;  %v48_v39 = vld [vmem:[#allocation2 + $0x40] sm:$0xff]  ;;  %v214_v41 = vmul.f32 %v44_v27, %v44_v27  ;;  %v215_v42 = vmul.f32 %v45_v28, %v45_v28  ;;  %v66_v45 = vld [vmem:[#allocation5 + $0x50] sm:$0xff] }
  0x31   :  { %766 = vmatprep.subr.bf16.mxu1 %v915_v0  ;;  %v987_v43 = vmul.f32 %v60_v24, %v44_v27  ;;  %v49_v44 = vld [vmem:[#allocation2 + $0x48] sm:$0xff]  ;;  %v67_v46 = vld [vmem:[#allocation5 + $0x58] sm:$0xff]  ;;  %v991_v47 = vmul.f32 %v61_v26, %v45_v28  ;;  %v993_v48 = vmul.f32 %v62_v30, %v46_v32  ;;  %v995_v49 = vmul.f32 %v63_v31, %v47_v33  ;;  %v50_v51 = vld [vmem:[#allocation2 + $0x50] sm:$0xff]  ;;  %p891_p6 = pnand %p890_p5, %p884_p2 }
  0x32   :  { %v997_v50 = vmul.f32 %v64_v37, %v48_v39  ;;  %v51_v52 = vld [vmem:[#allocation2 + $0x58] sm:$0xff]  ;;  %v68_v53 = vld [vmem:[#allocation5 + $0x60] sm:$0xff]  ;;  %v1002_v54 = vmul.f32 %v65_v38, %v49_v44  ;;  %v1004_v55 = vmul.f32 %v66_v45, %v50_v51  ;;  %v69_v57 = vld [vmem:[#allocation5 + $0x68] sm:$0xff]  ;;  %v739_v5 = vpack.c.bf16 %v77_v40, %v76_v36 }
  0x33   :  { %v1006_v56 = vmul.f32 %v67_v46, %v51_v52  ;;  %v52_v58 = vld [vmem:[#allocation2 + $0x60] sm:$0xff]  ;;  %v53_v59 = vld [vmem:[#allocation2 + $0x68] sm:$0xff]  ;;  %v70_v62 = vld [vmem:[#allocation5 + $0x70] sm:$0xff]  ;;  %v799_v7 = vpack.c.bf16 %v985_v35, %v983_v34  ;;  %v803_v8 = vpack.c.bf16 %v991_v47, %v987_v43  ;;  %v771_v11 = vpack.c.bf16 %v215_v42, %v214_v41 }
  0x34   :  { %v1009_v60 = vmul.f32 %v68_v53, %v52_v58  ;;  %v1011_v61 = vmul.f32 %v69_v57, %v53_v59  ;;  %v54_v63 = vld [vmem:[#allocation2 + $0x70] sm:$0xff]  ;;  %v71_v2 = vld [vmem:[#allocation5 + $0x78] sm:$0xff]  ;;  %v807_v13 = vpack.c.bf16 %v995_v49, %v993_v48  ;;  %v811_v14 = vpack.c.bf16 %v1002_v54, %v997_v50 }
  0x35   :  { %v55_v3 = vld [vmem:[#allocation2 + $0x78] sm:$0xff]  ;;  %v1013_v4 = vmul.f32 %v70_v62, %v54_v63  ;;  %v815_v15 = vpack.c.bf16 %v1006_v56, %v1004_v55  ;;  %v78_v18 = vmul.f32 %v62_v30, %v62_v30  ;;  %v79_v20 = vmul.f32 %v63_v31, %v63_v31 }
  0x36   :  { %v1015_v6 = vmul.f32 %v71_v2, %v55_v3  ;;  %v819_v16 = vpack.c.bf16 %v1011_v61, %v1009_v60  ;;  %v216_v21 = vmul.f32 %v46_v32, %v46_v32  ;;  %v217_v22 = vmul.f32 %v47_v33, %v47_v33 }
  0x37   :  { %737 = vmatpush3.bf16.xpose.msk.msra.mxu0 %vm969_vm2, %v735_v25  ;;  %v743_v23 = vpack.c.bf16 %v79_v20, %v78_v18  ;;  %v80_v25 = vmul.f32 %v64_v37, %v64_v37  ;;  %v81_v26 = vmul.f32 %v65_v38, %v65_v38  ;;  %v218_v27 = vmul.f32 %v48_v39, %v48_v39 }
  0x38   :  { %769 = vmatpush3.bf16.xpose.msk.msra.mxu1 %vm969_vm2, %v767_v29  ;;  %738 = vmatprep.subr.bf16.mxu0 %v915_v0  ;;  %v823_v17 = vpack.c.bf16 %v1015_v6, %v1013_v4  ;;  %v775_v24 = vpack.c.bf16 %v217_v22, %v216_v21  ;;  %v219_v28 = vmul.f32 %v49_v44, %v49_v44 }
  0x39   :  { %770 = vmatprep.subr.bf16.mxu1 %v915_v0  ;;  %v747_v29 = vpack.c.bf16 %v81_v26, %v80_v25  ;;  %v82_v31 = vmul.f32 %v66_v45, %v66_v45  ;;  %v83_v32 = vmul.f32 %v67_v46, %v67_v46  ;;  %v220_v33 = vmul.f32 %v50_v51, %v50_v51 }
  0x3a   :  { %v779_v30 = vpack.c.bf16 %v219_v28, %v218_v27  ;;  %v221_v36 = vmul.f32 %v51_v52, %v51_v52  ;;  %v84_v39 = vmul.f32 %v68_v53, %v68_v53  ;;  %v85_v40 = vmul.f32 %v69_v57, %v69_v57 }
  0x3b   :  { %v751_v37 = vpack.c.bf16 %v83_v32, %v82_v31  ;;  %v222_v41 = vmul.f32 %v52_v58, %v52_v58  ;;  %v223_v42 = vmul.f32 %v53_v59, %v53_v59  ;;  %v86_v46 = vmul.f32 %v70_v62, %v70_v62 }
  0x3c   :  { %v783_v38 = vpack.c.bf16 %v221_v36, %v220_v33  ;;  %v755_v44 = vpack.c.bf16 %v85_v40, %v84_v39  ;;  %v87_v51 = vmul.f32 %v71_v2, %v71_v2  ;;  %v224_v52 = vmul.f32 %v54_v63, %v54_v63 }
  0x3d   :  { %v787_v45 = vpack.c.bf16 %v223_v42, %v222_v41  ;;  %v225_v53 = vmul.f32 %v55_v3, %v55_v3  ;;  %v918_v59 = vmov 1.0  }
  0x3e   :  { %v759_v57 = vpack.c.bf16 %v87_v51, %v86_v46 }
  0x3f   :  { %741 = vmatpush3.bf16.xpose.msk.msra.mxu0 %vm969_vm2, %v739_v5  ;;  %v791_v58 = vpack.c.bf16 %v225_v53, %v224_v52 }
  0x40   :  { %773 = vmatpush3.bf16.xpose.msk.msra.mxu1 %vm969_vm2, %v771_v11  ;;  %742 = vmatprep.subr.bf16.mxu0 %v915_v0 }
  0x41   :  { %774 = vmatprep.subr.bf16.mxu1 %v915_v0 }
  0x47   :  { %745 = vmatpush3.bf16.xpose.msk.msra.mxu0 %vm969_vm2, %v743_v23 }
  0x48   :  { %777 = vmatpush3.bf16.xpose.msk.msra.mxu1 %vm969_vm2, %v775_v24  ;;  %746 = vmatprep.subr.bf16.mxu0 %v915_v0 }
  0x49   :  { %778 = vmatprep.subr.bf16.mxu1 %v915_v0 }
  0x4f   :  { %749 = vmatpush3.bf16.xpose.msk.msra.mxu0 %vm969_vm2, %v747_v29 }
  0x50   :  { %781 = vmatpush3.bf16.xpose.msk.msra.mxu1 %vm969_vm2, %v779_v30  ;;  %750 = vmatprep.subr.bf16.mxu0 %v915_v0 }
  0x51   :  { %782 = vmatprep.subr.bf16.mxu1 %v915_v0 }
  0x57   :  { %753 = vmatpush3.bf16.xpose.msk.msra.mxu0 %vm969_vm2, %v751_v37 }
  0x58   :  { %785 = vmatpush3.bf16.xpose.msk.msra.mxu1 %vm969_vm2, %v783_v38  ;;  %754 = vmatprep.subr.bf16.mxu0 %v915_v0 }
  0x59   :  { %786 = vmatprep.subr.bf16.mxu1 %v915_v0 }
  0x5f   :  { %757 = vmatpush3.bf16.xpose.msk.msra.mxu0 %vm969_vm2, %v755_v44 }
  0x60   :  { %789 = vmatpush3.bf16.xpose.msk.msra.mxu1 %vm969_vm2, %v787_v45  ;;  %758 = vmatprep.subr.bf16.mxu0 %v915_v0 }
  0x61   :  { %790 = vmatprep.subr.bf16.mxu1 %v915_v0 }
  0x67   :  { %761 = vmatpush3.bf16.xpose.msk.msra.mxu0 %vm969_vm2, %v759_v57 }
  0x68   :  { %793 = vmatpush3.bf16.xpose.msk.msra.mxu1 %vm969_vm2, %v791_v58  ;;  %794 = vmatprep.subr.bf16.mxu0 %v915_v0 }
  0x6e   :  { %658 = vmatmul.mubr.msk.f32.vlgmr.msra.gmra.mrb[0].mxu0 %vm88_vm1, %v918_v59 }
  0x6f   :  { %693 = vmatmul.mubr.msk.f32.vlgmr.msra.gmra.mrb[0].mxu1 %vm88_vm1, %v918_v59  ;;  %797 = vmatpush3.bf16.xpose.msk.msra.mxu0 %vm969_vm2, %v795_v19 }
  0x70   :  { %798 = vmatprep.subr.bf16.mxu0 %v915_v0  ;;  %727 = vmatprep.mubr.msk.f32.mxu0 %vm916_vm0, %v917_v1 }
  0x77   :  { %801 = vmatpush3.bf16.xpose.msk.msra.mxu0 %vm969_vm2, %v799_v7 }
  0x78   :  { %802 = vmatprep.subr.bf16.mxu0 %v915_v0 }
  0x7f   :  { %805 = vmatpush3.bf16.xpose.msk.msra.mxu0 %vm969_vm2, %v803_v8 }
  0x80   :  { %806 = vmatprep.subr.bf16.mxu0 %v915_v0 }
  0x87   :  { %809 = vmatpush3.bf16.xpose.msk.msra.mxu0 %vm969_vm2, %v807_v13 }
  0x88   :  { %810 = vmatprep.subr.bf16.mxu0 %v915_v0 }
  0x8f   :  { %813 = vmatpush3.bf16.xpose.msk.msra.mxu0 %vm969_vm2, %v811_v14 }
  0x90   :  { %814 = vmatprep.subr.bf16.mxu0 %v915_v0 }
  0x97   :  { %817 = vmatpush3.bf16.xpose.msk.msra.mxu0 %vm969_vm2, %v815_v15 }
  0x98   :  { %818 = vmatprep.subr.bf16.mxu0 %v915_v0 }
  0x9f   :  { %821 = vmatpush3.bf16.xpose.msk.msra.mxu0 %vm969_vm2, %v819_v16 }
  0xa0   :  { %822 = vmatprep.subr.bf16.mxu0 %v915_v0 }
  0xa7   :  { %825 = vmatpush3.bf16.xpose.msk.msra.mxu0 %vm969_vm2, %v823_v17 }
  0xae   :  { %728 = vmatmul.mubr.msk.f32.vlgmr.msra.gmra.mrb[2].mxu0 %vm88_vm1, %v918_v59 }
 0x141   :  { %v206_v1 = vpop.f32.mrb[0].mxu0 }
 0x142   :  { %v340_v9 = vpop.f32.mrb[0].mxu1  ;;  %v659_v12 = vpop.f32.mrb[1].mxu0  ;;  %v482_v19 = vmax.f32 %v206_v1, 0.10001  ;;  %v489_v10 = vadd.f32 1.0, %v206_v1 }
 0x143   :  { %v478_v34 = vadd.f32 %v340_v9, %v206_v1  ;;  %v491_v35 = vadd.f32 1.0, %v340_v9  ;;  %v495_v43 = vmul.f32 %v340_v9, %v206_v1  ;;  %v694_v47 = vpop.f32.mrb[1].mxu1 }
 0x144   :  { %v483_v48 = vmin.f32 %v482_v19, 0.99999 }
 0x145   :  { %v492_v49 = vmul.f32 %v491_v35, %v206_v1  ;;  %v496_v60 = vadd.f32 1.0, %v495_v43 }
 0x146   :  { %835 = vrsqrt.f32 %v483_v48  ;;  %v484_v0 = vsub.f32 1.0, %v483_v48 }
 0x148   :  { %v485_v50 = vmul.f32 0.1, %v484_v0 }
 0x150   :  { %v836_v54 = vpop.eup %835 }
 0x151   :  { %v487_v55 = vmul.f32 %v836_v54, %v485_v50 }
 0x153   :  { %488 = vst [vmem:[#allocation7] sm:$0x1] %v487_v55 }
 0x181   :  { %v474_v56 = vpop.f32.mrb[2].mxu0 }
 0x182   :  { %v479_v61 = vmul.f32 2.0, %v474_v56  ;;  %v490_v62 = vmul.f32 %v489_v10, %v474_v56  ;;  %v729_v63 = vpop.f32.mrb[3].mxu0 }
 0x184   :  { %v480_v2 = vsub.f32 %v478_v34, %v479_v61  ;;  %v493_v3 = vsub.f32 %v490_v62, %v492_v49  ;;  %v497_v4 = vsub.f32 %v496_v60, %v479_v61 }
 0x186   :  { %v481_v5 = vmax.f32 %v480_v2, 0.0 }
 0x188   :  { %v494_v6 = vmul.f32 %v481_v5, %v206_v1 }
 0x18a   :  { %v498_v7 = vmul.f32 %v497_v4, %v494_v6 }
 0x18c   :  { %v499_v8 = vmax.f32 %v498_v7, 0.0 }
 0x18e   :  { %837 = vrsqrt.f32 %v499_v8 }
 0x198   :  { %v838_v11 = vpop.eup %837 }
 0x199   :  { %v501_v13 = vmin.f32 %v838_v11, 100000.0 }
 0x19b   :  { %v502_v14 = vmul.f32 %v501_v13, %v493_v3 }
 0x19d   :  { %v573_v15 = vclamps-f32 %v502_v14, 0.99999 }
 0x19f   :  { %505 = vst [vmem:[#allocation7 + $0x1] sm:$0x1] %v573_v15 }
 0x1a0   :  { %894 = shalt.err (!%p891_p6)
}
 0x1a1   :  { %s895_s12 = scalar_lea.hbm %s1132_s2, 32 }
 0x1a2   :  { %p896_p7 = scmp.ne.s32.totalorder %s1132_s2, %s895_s12  ;;  %p899_p8 = scmp.lt.u32.totalorder %s895_s12, %s1132_s2 }
 0x1a4   :  { %p901_p9 = pnand %p899_p8, %p896_p7 }
 0x1a6   :  { %904 = shalt.err (!%p901_p9)
}
 0x1a7   :  { %515 = dma.vmem_to_hbm [thread:$0]  %s513_s8, 32, %s1132_s2, [#allocation4]  }
 0x1a8   :  { %909 = dma.done.wait [#allocation4], 32  }
 0x1a9   :  { %910 = vsyncadd [#allocation4], 4294967264 }
 0x1aa   :  { %519 = vsyncpa [#allocation3], 1 }
 0x1ab   :  { %520 = vsyncpa [#allocation6], 1 }
 0x1ac   :  { %521 = vsyncpa [#allocation4], 1 }

</bundles_post_ra>
